<compile_context>
chip_gen: v6e
topology: v6e:2x2x1
jax: 0.10.0
libtpu: 0.0.40
codegen_flags: <defaults>
</compile_context>

<pallas_src>
import jax
import jax.numpy as jnp
from jax import lax
from jax.experimental import pallas as pl
from jax.experimental.pallas import tpu as pltpu


def _round_up(x, m):
    return ((x + m - 1) // m) * m


def _make_gather_kernel(tb, d, pack):
    """Kernel gathering `tb` embedding rows per grid step from a VMEM-resident table."""
    rows_per_step = tb // pack

    def kernel(idx_ref, table_ref, out_ref):
        # idx_ref   : (n_pad,) int32, SMEM scalar-prefetch (token indices)
        # table_ref : (vocab, d) float32, resident in VMEM (constant block idx)
        # out_ref   : (tb // pack, pack * d) float32 output tile
        base = pl.program_id(0) * tb

        def body(r, carry):
            for p in range(pack):  # static, tiny (pack == 128 // d, e.g. 2)
                tok = idx_ref[base + r * pack + p]
                out_ref[pl.ds(r, 1), pl.ds(p * d, d)] = table_ref[pl.ds(tok, 1), :]
            return carry

        lax.fori_loop(0, rows_per_step, body, 0)

    return kernel


def embedding_lookup(indices_flat, emb_table, *, token_block=256):
    """Gather rows of `emb_table` at `indices_flat` -> (N, d)."""
    n = int(indices_flat.shape[0])
    vocab, d = (int(s) for s in emb_table.shape)

    # Pack several tokens per 128-lane output row when d < 128 so the output
    # tile written back to HBM is lane-dense.
    pack = 128 // d if (d < 128 and 128 % d == 0) else 1

    # Token-block size: multiple of (pack * 8) so the output tile's sublane
    # extent is a multiple of 8; don't over-pad tiny inputs.
    align = pack * 8
    tb = min(_round_up(token_block, align), _round_up(max(n, 1), align))
    n_pad = _round_up(max(n, 1), tb)

    # Clamp (jnp.take-style bounds safety) and pad with padding_idx row 0.
    idx = jnp.clip(indices_flat.astype(jnp.int32), 0, vocab - 1)
    idx = jnp.pad(idx, (0, n_pad - n))

    rows_per_step = tb // pack
    out_rows = n_pad // pack
    grid = (n_pad // tb,)

    itemsize = jnp.dtype(emb_table.dtype).itemsize
    table_bytes = vocab * d * itemsize
    out_bytes = n_pad * d * itemsize
    # Resident table (pipeline may double-buffer it) + output tiles + slack.
    vmem_limit = max(
        2 * table_bytes + 4 * rows_per_step * pack * d * itemsize + (1 << 20),
        32 * 1024 * 1024,
    )
    vmem_limit = min(int(vmem_limit), 120 * 1024 * 1024)

    out = pl.pallas_call(
        _make_gather_kernel(tb, d, pack),
        out_shape=jax.ShapeDtypeStruct((out_rows, pack * d), emb_table.dtype),
        grid_spec=pltpu.PrefetchScalarGridSpec(
            num_scalar_prefetch=1,
            grid=grid,
            in_specs=[
                # Whole table as one block with a constant index -> stays
                # resident in VMEM across all grid steps.
                pl.BlockSpec((vocab, d), lambda i, idx_ref: (0, 0)),
            ],
            out_specs=pl.BlockSpec(
                (rows_per_step, pack * d), lambda i, idx_ref: (i, 0)
            ),
        ),
        compiler_params=pltpu.CompilerParams(
            dimension_semantics=("parallel",),  # token blocks independent
            vmem_limit_bytes=vmem_limit,
        ),
        cost_estimate=pl.CostEstimate(
            flops=0,
            transcendentals=0,
            bytes_accessed=int(table_bytes + out_bytes + n_pad * 4),
        ),
    )(idx, emb_table)

    return out.reshape(n_pad, d)[:n]


class Word2VecPallas:
    """JAX/Pallas port of the PyTorch Word2Vec module (forward == forward_i)."""

    def __init__(self, V, d=50, padding_idx=0, key=None):
        self.V = V + 1
        self.d = d
        self.padding_idx = padding_idx
        key = jax.random.PRNGKey(0) if key is None else key
        ki, ko = jax.random.split(key)
        # nn.Embedding default init: N(0, 1), padding row zeroed.
        ivec = jax.random.normal(ki, (self.V, self.d), dtype=jnp.float32)
        ovec = jax.random.normal(ko, (self.V, self.d), dtype=jnp.float32)
        self.ivectors = ivec.at[padding_idx].set(0.0)
        self.ovectors = ovec.at[padding_idx].set(0.0)

    def _lookup(self, table, data):
        data = jnp.asarray(data, dtype=jnp.int32)
        flat = data.reshape(-1)
        out_flat = embedding_lookup(flat, table)
        return out_flat.reshape(data.shape + (self.d,))

    def forward(self, data):
        return self.forward_i(data)

    def forward_i(self, data):
        return self._lookup(self.ivectors, data)

    def forward_o(self, data):
        return self._lookup(self.ovectors, data)


if __name__ == "__main__":
    # Small deterministic example: vocab V=20 (table has V+1=21 rows), d=64,
    # batch=2, seq=8.
    key = jax.random.PRNGKey(0)
    k_model, k_idx = jax.random.split(key)

    V, d, B, S = 20, 64, 2, 8
    model = Word2VecPallas(V, d=d, padding_idx=0, key=k_model)

    data = jax.random.randint(k_idx, (B, S), minval=0, maxval=V + 1,
                              dtype=jnp.int32)

    out_i = jax.block_until_ready(model.forward(data))
    out_o = jax.block_until_ready(model.forward_o(data))

    # Sanity check against plain-JAX reference gather.
    ref_i = jnp.take(model.ivectors, data, axis=0)
    ref_o = jnp.take(model.ovectors, data, axis=0)
    assert out_i.shape == (B, S, d)
    assert out_i.dtype == jnp.float32
    assert jnp.allclose(out_i, ref_i)
    assert jnp.allclose(out_o, ref_o)

    print("KERNEL_OK")
</pallas_src>

<mosaic_0001>
module attributes {stable_mosaic.version = 11 : i64} {
  func.func @kernel(%arg0: i32, %arg1: memref<16xi32, #tpu.memory_space<smem>>, %arg2: memref<21x64xf32, #tpu.memory_space<vmem>>, %arg3: memref<8x128xf32, #tpu.memory_space<vmem>>) attributes {dimension_semantics = [#tpu.dimension_semantics<parallel>], iteration_bounds = array<i64: 1>, scalar_prefetch = 1 : i64, scratch_operands = 0 : i64, tpu.core_type = #tpu.core_type<tc>, window_params = [{pipeline_mode = #tpu.pipeline_mode<synchronous>, transform_indices = @transform_0, window_bounds = array<i64: 21, 64>}, {transform_indices = @transform_1, window_bounds = array<i64: 8, 128>}]} {
    %c16_i32 = arith.constant 16 : i32
    %0 = arith.muli %arg0, %c16_i32 : i32
    %c0_i32 = arith.constant 0 : i32
    %c8_i32 = arith.constant 8 : i32
    %1 = arith.addi %c0_i32, %c8_i32 : i32
    %c1_i32 = arith.constant 1 : i32
    scf.for %arg4 = %c0_i32 to %1 step %c1_i32  : i32 {
      %c2_i32 = arith.constant 2 : i32
      %2 = arith.muli %arg4, %c2_i32 : i32
      %3 = arith.addi %0, %2 : i32
      %c0_i32_1 = arith.constant 0 : i32
      %4 = arith.addi %3, %c0_i32_1 : i32
      %5 = arith.index_cast %4 : i32 to index
      %6 = memref.load %arg1[%5] : memref<16xi32, #tpu.memory_space<smem>>
      %7 = arith.index_cast %6 : i32 to index
      %c0 = arith.constant 0 : index
      %8 = vector.load %arg2[%7, %c0] : memref<21x64xf32, #tpu.memory_space<vmem>>, vector<1x64xf32>
      %9 = arith.index_cast %arg4 : i32 to index
      %c0_2 = arith.constant 0 : index
      %10 = vector.load %arg3[%9, %c0_2] : memref<8x128xf32, #tpu.memory_space<vmem>>, vector<1x64xf32>
      tpu.vector_store %arg3[%9, %c0_2], %8 {strides = array<i32>} : memref<8x128xf32, #tpu.memory_space<vmem>>, vector<1x64xf32>,
      %c2_i32_3 = arith.constant 2 : i32
      %11 = arith.muli %arg4, %c2_i32_3 : i32
      %12 = arith.addi %0, %11 : i32
      %c1_i32_4 = arith.constant 1 : i32
      %13 = arith.addi %12, %c1_i32_4 : i32
      %14 = arith.index_cast %13 : i32 to index
      %15 = memref.load %arg1[%14] : memref<16xi32, #tpu.memory_space<smem>>
      %16 = arith.index_cast %15 : i32 to index
      %c0_5 = arith.constant 0 : index
      %17 = vector.load %arg2[%16, %c0_5] : memref<21x64xf32, #tpu.memory_space<vmem>>, vector<1x64xf32>
      %18 = arith.index_cast %arg4 : i32 to index
      %c64 = arith.constant 64 : index
      %19 = vector.load %arg3[%18, %c64] : memref<8x128xf32, #tpu.memory_space<vmem>>, vector<1x64xf32>
      tpu.vector_store %arg3[%18, %c64], %17 {strides = array<i32>} : memref<8x128xf32, #tpu.memory_space<vmem>>, vector<1x64xf32>,
    }
    %c8_i32_0 = arith.constant 8 : i32
    return
  }
  func.func @transform_0(%arg0: i32, %arg1: memref<16xi32, #tpu.memory_space<smem>>) -> (i32, i32) {
    %c0_i32 = arith.constant 0 : i32
    %c0_i32_0 = arith.constant 0 : i32
    %c0_i32_1 = arith.constant 0 : i32
    return %c0_i32, %c0_i32_0 : i32, i32
  }
  func.func @transform_1(%arg0: i32, %arg1: memref<16xi32, #tpu.memory_space<smem>>) -> (i32, i32) {
    %c0_i32 = arith.constant 0 : i32
    %c0_i32_0 = arith.constant 0 : i32
    return %arg0, %c0_i32 : i32, i32
  }
}

</mosaic_0001>

<bundles_post_ra>
// kernel: tpu_custom_call.1
= control target key start
LH: loop header
LB: loop body
LE: loop exit
PB: predicated region body
PF: predicated region fallthrough
CT: control target
= control target key end

     0   :  { %s153_s9 = smov [#allocation3]   ;;  %s183_s0 = inlined_call_operand.hbm [shape: s32[16], index: 0, kind: input, shape index: {}]   ;;  %s184_s1 = inlined_call_operand.hbm [shape: f32[21,64], index: 1, kind: input, shape index: {}]   ;;  %s185_s2 = inlined_call_operand.hbm [shape: f32[8,128], index: 2, kind: output, shape index: {}]  }
   0x1   :  { %8 = dma.hbm_to_smem %s183_s0, 16, %s153_s9, [#allocation2] }
   0x2   :  { %143 = dma.done.wait [#allocation2], 16 }
   0x3   :  { %144 = vsyncadd [#allocation2], 4294967280 }
   0x4   :  { %10 = sfence }
   0x5   :  { %11 = vsyncpa [#allocation5], 0 }
   0x6   :  { %12 = vsyncpa [#allocation6], 0  ;;  %s154_s12 = smov [#allocation4]  }
   0x7   :  { %s18_s13 = sshll.u32 %s154_s12, 4  ;;  %s19_s13 = int_to_ptr.vmem [resolvable:$true] %s18_s13 }
   0x8   :  { %s107_s14 = scalar_lea.vmem %s19_s13, 384  ;;  %p112_p1 = scmp.lt.s32.totalorder %s19_s13, %s19_s13 }
   0x9   :  { %p108_p0 = scmp.ne.s32.totalorder %s19_s13, %s107_s14  ;;  %p113_p2 = scmp.lt.s32.totalorder %s107_s14, %s107_s14 }
   0xb   :  { %p114_p3 = por %p113_p2, %p112_p1 }
   0xd   :  { %p115_p4 = pnand %p114_p3, %p108_p0 }
   0xf   :  { %118 = shalt.err (!%p115_p4)
}
  0x10   :  { %s155_s15 = smov 128   ;;  %s156_s16 = smov 8  }
  0x11   :  { %24 = dma.hbm_to_vmem [thread:$0]  %s184_s1, 384, %s19_s13, [#allocation5], %s155_s15, %s155_s15, %s156_s16  }
  0x12   :  { %145 = dma.done.wait [#allocation5], 384  }
  0x13   :  { %146 = vsyncadd [#allocation5], 4294966912  ;;  %s149_s0 = smov 0  }
  0x14 LB: > { %s76_s19 = sshll.u32 %s151_s0, 1  ;;  %vm41_vm0 = vcmask 516096   ;;  %s40_s25 = scalar_lea.vmem [#allocation7], %s151_s0  ;;  %vm51_vm1 = vcmask 1040896   ;;  %s151_s0 = sphi %s149_s0, %s34_s0  }
  0x15   : > { %s37_s20 = sld [smem:[#allocation3 + %s76_s19]]  ;;  %s43_s21 = sadd.s32 1, %s76_s19 }
  0x16   : > { %s44_s22 = sld [smem:[#allocation3 + %s43_s21]]  ;;  %s157_s26 = smov 64  }
  0x17   : > { %s34_s0 = sadd.s32 1, %s151_s0  }
  0x18   : > { %p31_p5 = scmp.ge.s32.totalorder %s34_s0, 8  }
  0x19   :  { %s158_s1 = smov (%p31_p5), [#allocation7]  }
  0x1a   :  { %s59_s27 = sshll.u32 (%p31_p5), %s158_s1, 4  ;;  %s60_s27 = int_to_ptr.vmem [resolvable:$true] %s59_s27 }
  0x1b   : > { %s38_s23 = scalar_lea.vmem [#allocation4], %s37_s20  ;;  %s119_s28 = scalar_lea.vmem (%p31_p5), %s60_s27, 128 }
  0x1c   : > { %v39_v0 = vld [vmem:[%s38_s23] sm:$0x1]  ;;  %s45_s24 = scalar_lea.vmem [#allocation4], %s44_s22  ;;  %p120_p6 = scmp.ne.s32.totalorder (%p31_p5), %s60_s27, %s119_s28 }
  0x1d   : > { %v46_v1 = vld [vmem:[%s45_s24] sm:$0x1]  ;;  %42 = vst.msk [vmem:[%s40_s25] sm:$0x1] %vm41_vm0, %v39_v0  ;;  %p124_p7 = scmp.lt.s32.totalorder (%p31_p5), %s60_s27, %s60_s27  ;;  %p125_p8 = scmp.lt.s32.totalorder (%p31_p5), %s119_s28, %s119_s28 }
  0x1e   : > { %48 = vrot.lane.b32.xlu0 %v46_v1, %s157_s26 }
  0x1f   :  { %p126_p9 = por (%p31_p5), %p125_p8, %p124_p7 }
  0x21   :  { %p127_p10 = pnand (%p31_p5), %p126_p9, %p120_p6 }
  0x8d   :  { %33 = sbr.rel (!%p31_p5) target bundleno = 20 (0x14), region = 38 }
  0x90   : > { %v49_v2 = vpop.permute.xlu0 %48 }
  0x91   : > { %52 = vst.msk [vmem:[%s40_s25] sm:$0x1] %vm51_vm1, %v49_v2 }
  0x92   :  { %130 = shalt.err (!%p127_p10)
}
  0x93   :  { %62 = dma.vmem_to_hbm [thread:$0]  %s60_s27, 128, %s185_s2, [#allocation6]  }
  0x94   :  { %147 = dma.done.wait [#allocation6], 128  }
  0x95   :  { %148 = vsyncadd [#allocation6], 4294967168 }
  0x96   :  { %66 = vsyncpa [#allocation5], 1 }
  0x97   :  { %67 = vsyncpa [#allocation6], 1 }

</bundles_post_ra>
